<compile_context>
chip_gen: v7x
topology: tpu7x:2x2x1
jax: 0.10.0
libtpu: 0.0.40
codegen_flags: <defaults>
</compile_context>

<pallas_src>
import jax
import jax.numpy as jnp
import numpy as np
from jax.experimental import pallas as pl
from jax.experimental.pallas import tpu as pltpu

ARCSEC_TO_RAD = np.pi / (180.0 * 3600.0)


def _round_up(x, m):
    return ((x + m - 1) // m) * m


def _nudft_kernel(img_ref, a_ref, out_ref):
    # img_ref: (CH, TK) bf16   a_ref: (TK, TN) bf16   out_ref: (CH, TN) f32
    # grid = (N_pad // TN [parallel], P_pad // TK [reduction, last/arbitrary])
    # The output block index (0, j) is constant across the reduction axis, so
    # the block stays resident in VMEM and doubles as the f32 accumulator.
    @pl.when(pl.program_id(1) == 0)
    def _():
        out_ref[...] = jnp.zeros_like(out_ref)

    out_ref[...] += jnp.dot(img_ref[...], a_ref[...],
                            preferred_element_type=jnp.float32)


class NuFFTCachedPallas:
    """JAX/Pallas analogue of mpol.fourier.NuFFTCached (sparse_matrices=True path)."""

    def __init__(self, cell_size, npix, uu, vv, nchan=1,
                 tile_k=2048, tile_n=2048):
        assert uu.ndim == 1 and vv.ndim == 1, "cached layer uses 1D (same_uv) uu/vv"
        self.cell_size = float(cell_size)      # arcsec
        self.npix = int(npix)
        self.nchan = int(nchan)
        self.nvis = int(uu.shape[0])
        self.dl = self.cell_size * ARCSEC_TO_RAD   # radians / pixel

        # _assemble_ktraj: lambda -> radians per pixel, k_traj = vstack(vv, uu)
        uu_radpix = jnp.asarray(uu, jnp.float32) * (2.0 * np.pi) * self.dl
        vv_radpix = jnp.asarray(vv, jnp.float32) * (2.0 * np.pi) * self.dl
        self.k_traj = jnp.stack([vv_radpix, uu_radpix], axis=0)  # (2, nvis)

        n = self.npix
        self.P = n * n                       # flattened image size
        self.N = 2 * self.nvis               # [real | imag] fused output width

        # Tile sizes: lane-dim multiples of 128, clipped to the padded problem.
        self.tk = min(int(tile_k), _round_up(self.P, 128))
        self.tn = min(int(tile_n), _round_up(self.N, 128))
        self.P_pad = _round_up(self.P, self.tk)
        self.N_pad = _round_up(self.N, self.tn)
        # bf16 image tile: keep the sublane (channel) dim a multiple of 16.
        self.ch_pad = _round_up(max(self.nchan, 16), 16)

        # --- Cached NuDFT matrix with fftshift + cell_size**2 folded in. ---
        # shifted[r] = img[(r + n//2) % n]  =>  sum_r shifted[r]*E[r]
        #            = sum_{r'} img[r'] * E[(r' + n//2) % n]
        # so row r' of the *unshifted* image uses the centered index rolled by
        # -(n//2): idx_folded = roll(arange(n) - n//2, -(n//2)).
        idx = jnp.arange(n, dtype=jnp.float32) - (n // 2)
        idx_f = jnp.roll(idx, -(n // 2))

        row_ph = idx_f[:, None] * vv_radpix[None, :]               # (n, nvis)
        col_ph = idx_f[:, None] * uu_radpix[None, :]               # (n, nvis)
        phase = (row_ph[:, None, :] + col_ph[None, :, :]).reshape(self.P, self.nvis)

        scale = self.cell_size ** 2
        A = jnp.concatenate(
            [scale * jnp.cos(phase), scale * (-jnp.sin(phase))], axis=1
        )                                                           # (P, 2*nvis) f32
        A = A.astype(jnp.bfloat16)                                  # halve HBM stream
        A = jnp.pad(A, ((0, self.P_pad - self.P), (0, self.N_pad - self.N)))
        self.A = A                                                  # (P_pad, N_pad) bf16

        # VMEM budget: double-buffered A + img streams and the resident output.
        vmem_need = (2 * self.tk * self.tn * 2
                     + 2 * self.ch_pad * self.tk * 2
                     + 2 * self.ch_pad * self.tn * 4)
        self.vmem_limit = int(min(max(2 * vmem_need, 16 << 20), 48 << 20))

        n_j = self.N_pad // self.tn
        self.cost = pl.CostEstimate(
            flops=int(2 * self.ch_pad * self.P_pad * self.N_pad),
            transcendentals=0,
            bytes_accessed=int(self.P_pad * self.N_pad * 2          # A streamed once
                               + n_j * self.ch_pad * self.P_pad * 2  # img per j-block
                               + self.ch_pad * self.N_pad * 4),      # output
        )

    def __call__(self, packed_cube):
        assert packed_cube.shape == (self.nchan, self.npix, self.npix)

        # fftshift + scale are folded into self.A -> just flatten, pad, cast.
        img = packed_cube.astype(jnp.float32).reshape(self.nchan, self.P)
        img = jnp.pad(img, ((0, self.ch_pad - self.nchan),
                            (0, self.P_pad - self.P)))
        img = img.astype(jnp.bfloat16)                 # bf16 x bf16 MXU path

        grid = (self.N_pad // self.tn, self.P_pad // self.tk)

        out = pl.pallas_call(
            _nudft_kernel,
            out_shape=jax.ShapeDtypeStruct((self.ch_pad, self.N_pad), jnp.float32),
            grid=grid,
            in_specs=[
                pl.BlockSpec((self.ch_pad, self.tk), lambda j, k: (0, k)),
                pl.BlockSpec((self.tk, self.tn), lambda j, k: (k, j)),
            ],
            out_specs=pl.BlockSpec((self.ch_pad, self.tn), lambda j, k: (0, j)),
            compiler_params=pltpu.CompilerParams(
                dimension_semantics=("parallel", "arbitrary"),
                vmem_limit_bytes=self.vmem_limit,
            ),
            cost_estimate=self.cost,
        )(img, self.A)

        out = out[: self.nchan, : self.N]
        out_r = out[:, : self.nvis]
        out_i = out[:, self.nvis:]
        return (out_r + 1j * out_i).astype(jnp.complex64)            # (nchan, nvis)


if __name__ == "__main__":
    key = jax.random.PRNGKey(0)
    k_img, k_uu, k_vv = jax.random.split(key, 3)

    nchan, npix, nvis = 4, 16, 128
    cell_size = 0.05  # arcsec

    # uu, vv in lambda; keep |k| = 2*pi*dl*|u| well inside [-pi, pi).
    uu = jax.random.uniform(k_uu, (nvis,), jnp.float32, -1.0e5, 1.0e5)
    vv = jax.random.uniform(k_vv, (nvis,), jnp.float32, -1.0e5, 1.0e5)

    packed_cube = jax.random.normal(k_img, (nchan, npix, npix), jnp.float32)

    layer = NuFFTCachedPallas(cell_size, npix, uu, vv, nchan=nchan)
    out = jax.block_until_ready(layer(packed_cube))
    assert out.shape == (nchan, nvis) and jnp.iscomplexobj(out)

    # --- Reference 1: exact f64 NuDFT with explicit fftshift (original semantics). ---
    img_np = np.asarray(packed_cube, dtype=np.float64)
    shifted = np.fft.fftshift(img_np, axes=(1, 2)).reshape(nchan, npix * npix)
    idx = np.arange(npix, dtype=np.float64) - npix // 2
    uu_radpix = np.asarray(uu, np.float64) * 2 * np.pi * cell_size * ARCSEC_TO_RAD
    vv_radpix = np.asarray(vv, np.float64) * 2 * np.pi * cell_size * ARCSEC_TO_RAD
    phase = (vv_radpix[:, None, None] * idx[None, :, None]
             + uu_radpix[:, None, None] * idx[None, None, :]).reshape(nvis, -1)
    Ar = np.cos(phase).T
    Ai = (-np.sin(phase)).T
    ref_exact = (cell_size ** 2) * (shifted @ Ar + 1j * (shifted @ Ai))
    np.testing.assert_allclose(np.asarray(out), ref_exact, rtol=2e-2, atol=1e-3)

    # --- Reference 2: same bf16 cached matrices / bf16 image in f64 (checks the
    #     Pallas accumulation path exactly). ---
    A64 = np.asarray(layer.A[: layer.P, : layer.N].astype(jnp.float32),
                     dtype=np.float64)
    img_bf = jnp.asarray(packed_cube, jnp.float32).astype(jnp.bfloat16)
    img64 = np.asarray(img_bf.astype(jnp.float32), dtype=np.float64).reshape(nchan, -1)
    ref_same = img64 @ A64
    ref_same = ref_same[:, :nvis] + 1j * ref_same[:, nvis:]
    np.testing.assert_allclose(np.asarray(out), ref_same, rtol=1e-4, atol=1e-6)

    print("KERNEL_OK")
</pallas_src>

<mosaic_0001>
module attributes {stable_mosaic.version = 11 : i64} {
  func.func @_nudft_kernel(%arg0: i32, %arg1: i32, %arg2: memref<16x256xbf16, #tpu.memory_space<vmem>>, %arg3: memref<256x256xbf16, #tpu.memory_space<vmem>>, %arg4: memref<16x256xf32, #tpu.memory_space<vmem>>) attributes {dimension_semantics = [#tpu.dimension_semantics<parallel>, #tpu.dimension_semantics<arbitrary>], iteration_bounds = array<i64: 1, 1>, scalar_prefetch = 0 : i64, scratch_operands = 0 : i64, tpu.core_type = #tpu.core_type<tc>, window_params = [{transform_indices = @transform_0, window_bounds = array<i64: 16, 256>}, {transform_indices = @transform_1, window_bounds = array<i64: 256, 256>}, {transform_indices = @transform_2, window_bounds = array<i64: 16, 256>}]} {
    %c0_i32 = arith.constant 0 : i32
    %0 = arith.cmpi eq, %arg1, %c0_i32 : i32
    %1 = arith.extui %0 : i1 to i32
    %c0_i32_0 = arith.constant 0 : i32
    %2 = arith.cmpi ne, %1, %c0_i32_0 : i32
    scf.if %2 {
      %cst_8 = arith.constant 0.000000e+00 : f32
      %9 = vector.broadcast %cst_8 : f32 to vector<16x256xf32>
      %c0_9 = arith.constant 0 : index
      %c0_10 = arith.constant 0 : index
      %10 = vector.load %arg4[%c0_9, %c0_10] : memref<16x256xf32, #tpu.memory_space<vmem>>, vector<16x256xf32>
      tpu.vector_store %arg4[%c0_9, %c0_10], %9 {strides = array<i32>} : memref<16x256xf32, #tpu.memory_space<vmem>>, vector<16x256xf32>,
    } else {
    }
    %c0 = arith.constant 0 : index
    %c0_1 = arith.constant 0 : index
    %3 = vector.load %arg4[%c0, %c0_1] : memref<16x256xf32, #tpu.memory_space<vmem>>, vector<16x256xf32>
    %c0_2 = arith.constant 0 : index
    %c0_3 = arith.constant 0 : index
    %4 = vector.load %arg2[%c0_2, %c0_3] : memref<16x256xbf16, #tpu.memory_space<vmem>>, vector<16x256xbf16>
    %c0_4 = arith.constant 0 : index
    %c0_5 = arith.constant 0 : index
    %5 = vector.load %arg3[%c0_4, %c0_5] : memref<256x256xbf16, #tpu.memory_space<vmem>>, vector<256x256xbf16>
    %cst = arith.constant dense<0.000000e+00> : vector<16x256xf32>
    %6 = tpu.matmul %4, %5, %cst {dimension_numbers = #tpu.dot_dimension_numbers<[1], [0], [0], [1], [0, 0, 1, 1], [], []>} : vector<16x256xbf16>, vector<256x256xbf16>, vector<16x256xf32> -> vector<16x256xf32>
    %7 = arith.addf %3, %6 : vector<16x256xf32>
    %c0_6 = arith.constant 0 : index
    %c0_7 = arith.constant 0 : index
    %8 = vector.load %arg4[%c0_6, %c0_7] : memref<16x256xf32, #tpu.memory_space<vmem>>, vector<16x256xf32>
    tpu.vector_store %arg4[%c0_6, %c0_7], %7 {strides = array<i32>} : memref<16x256xf32, #tpu.memory_space<vmem>>, vector<16x256xf32>,
    return
  }
  func.func @transform_0(%arg0: i32, %arg1: i32) -> (i32, i32) {
    %c0_i32 = arith.constant 0 : i32
    %c0_i32_0 = arith.constant 0 : i32
    return %c0_i32, %arg1 : i32, i32
  }
  func.func @transform_1(%arg0: i32, %arg1: i32) -> (i32, i32) {
    %c0_i32 = arith.constant 0 : i32
    return %arg1, %arg0 : i32, i32
  }
  func.func @transform_2(%arg0: i32, %arg1: i32) -> (i32, i32) {
    %c0_i32 = arith.constant 0 : i32
    %c0_i32_0 = arith.constant 0 : i32
    return %c0_i32, %arg0 : i32, i32
  }
}

</mosaic_0001>

<bundles_post_ra>
// kernel: tpu_custom_call.1
= control target key start
LH: loop header
LB: loop body
LE: loop exit
PB: predicated region body
PF: predicated region fallthrough
CT: control target
= control target key end

     0   :  { %7 = vsyncpa [#allocation3], 0  ;;  %s548_s0 = inlined_call_operand.hbm [shape: bf16[16,256], index: 0, kind: input, shape index: {}]   ;;  %s549_s1 = inlined_call_operand.hbm [shape: bf16[256,256], index: 1, kind: input, shape index: {}]   ;;  %s550_s2 = inlined_call_operand.hbm [shape: f32[16,256], index: 2, kind: output, shape index: {}]  }
   0x1   :  { %8 = vsyncpa [#allocation6], 0 }
   0x2   :  { %9 = vsyncpa [#allocation4], 0  ;;  %s490_s9 = smov [#allocation2]   ;;  %s418_s13 = scalar_lea.hbm %s548_s0, 256 }
   0x3   :  { %s15_s10 = sshll.u32 %s490_s9, 4  ;;  %p419_p0 = scmp.ne.s32.totalorder %s548_s0, %s418_s13  ;;  %s16_s10 = int_to_ptr.vmem [resolvable:$true] %s15_s10 }
   0x4   :  { %p422_p1 = scmp.lt.u32.totalorder %s418_s13, %s548_s0 }
   0x6   :  { %p424_p2 = pnand %p422_p1, %p419_p0 }
   0x8   :  { %427 = shalt.err (!%p424_p2)
}
   0x9   :  { %s428_s18 = scalar_lea.vmem %s16_s10, 256  ;;  %p433_p4 = scmp.lt.s32.totalorder %s16_s10, %s16_s10 }
   0xa   :  { %p429_p3 = scmp.ne.s32.totalorder %s16_s10, %s428_s18  ;;  %p434_p5 = scmp.lt.s32.totalorder %s428_s18, %s428_s18 }
   0xc   :  { %p435_p6 = por %p434_p5, %p433_p4 }
   0xe   :  { %p436_p7 = pnand %p435_p6, %p429_p3 }
  0x10   :  { %439 = shalt.err (!%p436_p7)
}
  0x11   :  { %s491_s19 = smov 128   ;;  %s492_s20 = smov 8  }
  0x12   :  { %21 = dma.hbm_to_vmem [thread:$0]  %s548_s0, 256, %s16_s10, [#allocation3], %s491_s19, %s491_s19, %s492_s20  }
  0x13   :  { %s493_s23 = smov [#allocation5]   ;;  %s440_s27 = scalar_lea.hbm %s549_s1, 4096 }
  0x14   :  { %s27_s24 = sshll.u32 %s493_s23, 4  ;;  %p441_p8 = scmp.ne.s32.totalorder %s549_s1, %s440_s27  ;;  %s28_s24 = int_to_ptr.vmem [resolvable:$true] %s27_s24 }
  0x15   :  { %p444_p9 = scmp.lt.u32.totalorder %s440_s27, %s549_s1 }
  0x17   :  { %p446_p10 = pnand %p444_p9, %p441_p8 }
  0x19   :  { %449 = shalt.err (!%p446_p10)
}
  0x1a   :  { %s450_s4 = scalar_lea.vmem %s28_s24, 4096  ;;  %p455_p12 = scmp.lt.s32.totalorder %s28_s24, %s28_s24 }
  0x1b   :  { %p451_p11 = scmp.ne.s32.totalorder %s28_s24, %s450_s4  ;;  %p456_p13 = scmp.lt.s32.totalorder %s450_s4, %s450_s4 }
  0x1d   :  { %p457_p0 = por %p456_p13, %p455_p12 }
  0x1f   :  { %p458_p1 = pnand %p457_p0, %p451_p11 }
  0x21   :  { %461 = shalt.err (!%p458_p1)
}
  0x22   :  { %33 = dma.hbm_to_vmem [thread:$0]  %s549_s1, 4096, %s28_s24, [#allocation6], %s491_s19, %s491_s19, %s492_s20  }
  0x23   :  { %484 = dma.done.wait [#allocation3], 256  }
  0x24   :  { %485 = vsyncadd [#allocation3], 4294967040 }
  0x25   :  { %486 = dma.done.wait [#allocation6], 4096  }
  0x26   :  { %487 = vsyncadd [#allocation6], 4294963200  ;;  %v367_v0 = vld [vmem:[#allocation5 + $0x4] ss:$8 sps:$4 sm:$0xff]   ;;  %v369_v1 = vld [vmem:[#allocation5] ss:$8 sps:$4 sm:$0xff]  }
  0x27   :  { %256 = vmatprep.subr.bf16.mxu0 %v367_v0  ;;  %v370_v2 = vld [vmem:[#allocation5 + $0x14] ss:$8 sps:$4 sm:$0xff]   ;;  %v372_v3 = vld [vmem:[#allocation5 + $0x10] ss:$8 sps:$4 sm:$0xff]   ;;  %v373_v4 = vld [vmem:[#allocation5 + $0x24] ss:$8 sps:$4 sm:$0xff]  }
  0x28   :  { %257 = vmatpush1.bf16.msra.mxu0 %v369_v1  ;;  %v375_v5 = vld [vmem:[#allocation5 + $0x20] ss:$8 sps:$4 sm:$0xff]   ;;  %v376_v6 = vld [vmem:[#allocation5 + $0x34] ss:$8 sps:$4 sm:$0xff]   ;;  %v378_v7 = vld [vmem:[#allocation5 + $0x30] ss:$8 sps:$4 sm:$0xff]  }
  0x29   :  { %258 = vmatprep.subr.bf16.mxu0 %v370_v2  ;;  %v379_v8 = vld [vmem:[#allocation5 + $0x44] ss:$8 sps:$4 sm:$0xff]   ;;  %v381_v9 = vld [vmem:[#allocation5 + $0x40] ss:$8 sps:$4 sm:$0xff]   ;;  %v382_v10 = vld [vmem:[#allocation5 + $0x54] ss:$8 sps:$4 sm:$0xff]  }
  0x2a   :  { %v384_v11 = vld [vmem:[#allocation5 + $0x50] ss:$8 sps:$4 sm:$0xff]   ;;  %v385_v12 = vld [vmem:[#allocation5 + $0x64] ss:$8 sps:$4 sm:$0xff]   ;;  %v417_v13 = vld [vmem:[#allocation2 + $0x4] ss:$8 sps:$4 sm:$0xff]  }
  0x2b   :  { %v387_v14 = vld [vmem:[#allocation5 + $0x60] ss:$8 sps:$4 sm:$0xff]   ;;  %v388_v15 = vld [vmem:[#allocation5 + $0x74] ss:$8 sps:$4 sm:$0xff]   ;;  %288 = vmatprep.mubr.bf16.mxu0 %v417_v13  ;;  %v390_v16 = vld [vmem:[#allocation5 + $0x70] ss:$8 sps:$4 sm:$0xff]  }
  0x2c   :  { %259 = vmatpush1.bf16.msra.mxu0 %v372_v3  ;;  %v391_v17 = vld [vmem:[#allocation5 + $0x84] ss:$8 sps:$4 sm:$0xff]   ;;  %v393_v18 = vld [vmem:[#allocation5 + $0x80] ss:$8 sps:$4 sm:$0xff]   ;;  %v394_v19 = vld [vmem:[#allocation5 + $0x94] ss:$8 sps:$4 sm:$0xff]  }
  0x2d   :  { %260 = vmatprep.subr.bf16.mxu0 %v373_v4  ;;  %v396_v20 = vld [vmem:[#allocation5 + $0x90] ss:$8 sps:$4 sm:$0xff]   ;;  %v397_v21 = vld [vmem:[#allocation5 + $0xa4] ss:$8 sps:$4 sm:$0xff]   ;;  %v399_v22 = vld [vmem:[#allocation5 + $0xa0] ss:$8 sps:$4 sm:$0xff]  }
  0x2e   :  { %v400_v23 = vld [vmem:[#allocation5 + $0xb4] ss:$8 sps:$4 sm:$0xff]   ;;  %v402_v24 = vld [vmem:[#allocation5 + $0xb0] ss:$8 sps:$4 sm:$0xff]   ;;  %v403_v25 = vld [vmem:[#allocation5 + $0xc4] ss:$8 sps:$4 sm:$0xff]  }
  0x2f   :  { %v405_v26 = vld [vmem:[#allocation5 + $0xc0] ss:$8 sps:$4 sm:$0xff]   ;;  %v406_v27 = vld [vmem:[#allocation5 + $0xd4] ss:$8 sps:$4 sm:$0xff]   ;;  %v408_v28 = vld [vmem:[#allocation5 + $0xd0] ss:$8 sps:$4 sm:$0xff]  }
  0x30   :  { %261 = vmatpush1.bf16.msra.mxu0 %v375_v5  ;;  %v409_v29 = vld [vmem:[#allocation5 + $0xe4] ss:$8 sps:$4 sm:$0xff]   ;;  %v411_v30 = vld [vmem:[#allocation5 + $0xe0] ss:$8 sps:$4 sm:$0xff]   ;;  %v412_v31 = vld [vmem:[#allocation5 + $0xf4] ss:$8 sps:$4 sm:$0xff]  }
  0x31   :  { %262 = vmatprep.subr.bf16.mxu0 %v376_v6  ;;  %v414_v32 = vld [vmem:[#allocation5 + $0xf0] ss:$8 sps:$4 sm:$0xff]   ;;  %s494_s1 = smov [#allocation7]  }
  0x32   :  { %v415_v33 = vld [vmem:[#allocation2] ss:$8 sps:$4 sm:$0xff]   ;;  %s312_s6 = sshll.u32 %s494_s1, 4  ;;  %s313_s6 = int_to_ptr.vmem [resolvable:$true] %s312_s6 }
  0x33   :  { %s462_s7 = scalar_lea.vmem %s313_s6, 512  ;;  %p467_p3 = scmp.lt.s32.totalorder %s313_s6, %s313_s6 }
  0x34   :  { %263 = vmatpush1.bf16.msra.mxu0 %v378_v7  ;;  %p463_p2 = scmp.ne.s32.totalorder %s313_s6, %s462_s7  ;;  %p468_p4 = scmp.lt.s32.totalorder %s462_s7, %s462_s7 }
  0x35   :  { %264 = vmatprep.subr.bf16.mxu0 %v379_v8 }
  0x36   :  { %p469_p5 = por %p468_p4, %p467_p3 }
  0x38   :  { %265 = vmatpush1.bf16.msra.mxu0 %v381_v9  ;;  %p470_p6 = pnand %p469_p5, %p463_p2 }
  0x39   :  { %266 = vmatprep.subr.bf16.mxu0 %v382_v10 }
  0x3c   :  { %267 = vmatpush1.bf16.msra.mxu0 %v384_v11 }
  0x3d   :  { %268 = vmatprep.subr.bf16.mxu0 %v385_v12 }
  0x40   :  { %269 = vmatpush1.bf16.msra.mxu0 %v387_v14 }
  0x41   :  { %270 = vmatprep.subr.bf16.mxu0 %v388_v15 }
  0x44   :  { %271 = vmatpush1.bf16.msra.mxu0 %v390_v16 }
  0x45   :  { %272 = vmatprep.subr.bf16.mxu0 %v391_v17 }
  0x48   :  { %273 = vmatpush1.bf16.msra.mxu0 %v393_v18 }
  0x49   :  { %274 = vmatprep.subr.bf16.mxu0 %v394_v19 }
  0x4c   :  { %275 = vmatpush1.bf16.msra.mxu0 %v396_v20 }
  0x4d   :  { %276 = vmatprep.subr.bf16.mxu0 %v397_v21 }
  0x50   :  { %277 = vmatpush1.bf16.msra.mxu0 %v399_v22 }
  0x51   :  { %278 = vmatprep.subr.bf16.mxu0 %v400_v23 }
  0x54   :  { %279 = vmatpush1.bf16.msra.mxu0 %v402_v24 }
  0x55   :  { %280 = vmatprep.subr.bf16.mxu0 %v403_v25 }
  0x58   :  { %281 = vmatpush1.bf16.msra.mxu0 %v405_v26 }
  0x59   :  { %282 = vmatprep.subr.bf16.mxu0 %v406_v27 }
  0x5c   :  { %283 = vmatpush1.bf16.msra.mxu0 %v408_v28 }
  0x5d   :  { %284 = vmatprep.subr.bf16.mxu0 %v409_v29 }
  0x60   :  { %285 = vmatpush1.bf16.msra.mxu0 %v411_v30 }
  0x61   :  { %286 = vmatprep.subr.bf16.mxu0 %v412_v31 }
  0x64   :  { %287 = vmatpush1.bf16.msra.mxu0 %v414_v32 }
  0x67   :  { %289 = vmatmul.mubr.bf16.vlgmr.msra.gmra.mrb[0].mxu0 %v415_v33 }
 0x13a   :  { %v290_v34 = vpop.f32.mrb[0].mxu0 }
 0x13b   :  { %v292_v35 = vpop.f32.mrb[1].mxu0  ;;  %303 = vst [vmem:[#allocation7] sm:$0xff] %v290_v34 }
 0x13c   :  { %v294_v36 = vpop.f32.mrb[2].mxu0  ;;  %304 = vst [vmem:[#allocation7 + $0x8] sm:$0xff] %v292_v35 }
 0x13d   :  { %v296_v37 = vpop.f32.mrb[3].mxu0  ;;  %305 = vst [vmem:[#allocation7 + $0x10] sm:$0xff] %v294_v36 }
 0x13e   :  { %306 = vst [vmem:[#allocation7 + $0x18] sm:$0xff] %v296_v37 }
 0x13f   :  { %473 = shalt.err (!%p470_p6)
}
 0x140   :  { %s474_s10 = scalar_lea.hbm %s550_s2, 512 }
 0x141   :  { %p475_p7 = scmp.ne.s32.totalorder %s550_s2, %s474_s10  ;;  %p478_p8 = scmp.lt.u32.totalorder %s474_s10, %s550_s2 }
 0x143   :  { %p480_p9 = pnand %p478_p8, %p475_p7 }
 0x145   :  { %483 = shalt.err (!%p480_p9)
}
 0x146   :  { %s495_s15 = smov 256   ;;  %s496_s16 = smov 16  }
 0x147   :  { %318 = dma.vmem_to_hbm [thread:$0]  %s313_s6, 512, %s550_s2, [#allocation4], %s495_s15, %s495_s15, %s496_s16  }
 0x148   :  { %488 = dma.done.wait [#allocation4], 512  }
 0x149   :  { %489 = vsyncadd [#allocation4], 4294966784 }
 0x14a   :  { %322 = vsyncpa [#allocation3], 1 }
 0x14b   :  { %323 = vsyncpa [#allocation6], 1 }
 0x14c   :  { %324 = vsyncpa [#allocation4], 1 }

</bundles_post_ra>
